<compile_context>
chip_gen: v5e
topology: v5e:2x2
jax: 0.10.0
libtpu: 0.0.40
codegen_flags: <defaults>
</compile_context>

<pallas_src>
import functools

import numpy as np
import jax
import jax.numpy as jnp
from jax import lax
from jax.experimental import pallas as pl
from jax.experimental.pallas import tpu as pltpu

TAU = 0.07


# ----------------------------------------------------------------------------
# Kernel 1 (fused): uncertainty + per-tile top-k candidate selection.
#   u[b, n] = sum_c pred[b, c, n] * log(pred[b, c, n] + 1e-6)
# ----------------------------------------------------------------------------
def _unc_topk_kernel(pred_ref, vals_ref, idx_ref, *, tn, n_total, sample_num,
                     s_out):
    t = pl.program_id(1)
    base = t * tn

    # Uncertainty for this tile: static unroll over C (no XLU sublane reduce).
    c_dim = pred_ref.shape[1]
    acc = None
    for c in range(c_dim):
        p = pred_ref[0, c, :].astype(jnp.float32)            # (TN,)
        term = p * jnp.log(p + 1e-6)
        acc = term if acc is None else acc + term
    u = acc.reshape(1, tn)                                    # (1, TN)

    gidx = base + lax.broadcasted_iota(jnp.int32, (1, tn), 1)
    # Mask the ragged tail (pixels past N): their block contents are
    # unspecified padding, so force them to -inf before any reduction.
    u = jnp.where(gidx < n_total, u, -jnp.inf)

    # Iterative, fully vectorized top-`sample_num` of this tile.
    lane = lax.broadcasted_iota(jnp.int32, (1, s_out), 1)
    vals = jnp.full((1, s_out), -jnp.inf, jnp.float32)
    idxs = jnp.zeros((1, s_out), jnp.int32)
    cur = u
    for s in range(sample_num):
        vmax = jnp.max(cur, axis=-1, keepdims=True)                      # (1,1)
        imax = jnp.min(jnp.where(cur == vmax, gidx, jnp.int32(2 ** 30)),
                       axis=-1, keepdims=True)                           # (1,1)
        imax = jnp.minimum(imax, n_total - 1)                            # safety
        vals = jnp.where(lane == s, vmax, vals)
        idxs = jnp.where(lane == s, imax, idxs)
        cur = jnp.where(gidx == imax, -jnp.inf, cur)

    vals_ref[...] = vals.reshape(1, 1, s_out)
    idx_ref[...] = idxs.reshape(1, 1, s_out)


def _pick_tile(n, c, itemsize, vmem_budget_bytes=4 << 20):
    """Largest lane-aligned pixel tile within a ~4 MiB double-buffer budget."""
    n_pad = 128 * pl.cdiv(n, 128)
    cap = min(n_pad, 32768)
    tn = 128
    while tn * 2 <= cap and 2 * c * (tn * 2) * itemsize <= vmem_budget_bytes:
        tn *= 2
    return tn


def select_top_uncertain(pred, sample_num):
    """pred: (B, C, H, W) -> (B, sample_num) int32 flat pixel indices."""
    B, C, H, W = pred.shape
    N = H * W
    TN = _pick_tile(N, C, pred.dtype.itemsize)
    NT = pl.cdiv(N, TN)                        # ragged tail masked in-kernel
    S_OUT = 128 * pl.cdiv(sample_num, 128)     # lane-dense candidate slot
    pred_flat = pred.reshape(B, C, N)

    kernel = functools.partial(_unc_topk_kernel, tn=TN, n_total=N,
                               sample_num=sample_num, s_out=S_OUT)
    vals, idxs = pl.pallas_call(
        kernel,
        out_shape=(jax.ShapeDtypeStruct((B, 1, NT * S_OUT), jnp.float32),
                   jax.ShapeDtypeStruct((B, 1, NT * S_OUT), jnp.int32)),
        grid=(B, NT),
        in_specs=[pl.BlockSpec((1, C, TN), lambda b, t: (b, 0, t))],
        out_specs=(pl.BlockSpec((1, 1, S_OUT), lambda b, t: (b, 0, t)),
                   pl.BlockSpec((1, 1, S_OUT), lambda b, t: (b, 0, t))),
        compiler_params=pltpu.CompilerParams(
            dimension_semantics=("parallel", "parallel")),
    )(pred_flat)

    vals = vals.reshape(B, NT * S_OUT)
    idxs = idxs.reshape(B, NT * S_OUT)
    _, cand_pos = lax.top_k(vals, sample_num)                 # tiny table
    sel_idx = jnp.take_along_axis(idxs, cand_pos, axis=1)     # (B, S)
    return sel_idx


# ----------------------------------------------------------------------------
# Kernel 2: batched contrastive loss, ONE grid step for all B batch elements.
#   c_ref : (B, S, D)      selected (un-normalized) current projections
#   p_ref : (B, P, S, D)   selected (un-normalized) positive projections
#   out   : (B, 128)       per-batch mean loss broadcast across lanes
# ----------------------------------------------------------------------------
def _contrast_kernel(c_ref, p_ref, out_ref, *, tau, sample_num):
    c = c_ref[...].astype(jnp.float32)          # (B, S, D)
    p = p_ref[...].astype(jnp.float32)          # (B, P, S, D)

    # F.normalize(x, dim=-1): x / max(||x||_2, 1e-12)
    cn = c / jnp.maximum(jnp.sqrt(jnp.sum(c * c, axis=-1, keepdims=True)), 1e-12)
    pn = p / jnp.maximum(jnp.sqrt(jnp.sum(p * p, axis=-1, keepdims=True)), 1e-12)

    # positive term: sum over P positives of cos(c_i, p_{k,i})      -> (B, S)
    pos = jnp.sum(jnp.sum(cn[:, None, :, :] * pn, axis=-1), axis=1)
    # negative term: pairwise cosine matrix among the S samples     -> (B, S, S)
    mat = jnp.sum(cn[:, :, None, :] * cn[:, None, :, :], axis=-1)
    # exact diagonal: mat[i, i] == ||cn_i||^2 (handles zero rows too)
    diag = jnp.sum(cn * cn, axis=-1)                                      # (B, S)
    neg = jnp.sum(jnp.exp(mat / tau), axis=2) - jnp.exp(diag / tau)       # (B, S)

    # stable form of -log(pos_e / (pos_e + neg + 1e-8))
    losses = jnp.log(1.0 + (neg + 1e-8) * jnp.exp(-pos / tau))            # (B, S)
    per_b = jnp.sum(losses, axis=-1, keepdims=True) / sample_num          # (B, 1)
    out_ref[...] = jnp.broadcast_to(per_b, out_ref.shape)                 # lane-dense


def _contrast_losses(curr_sel, pos_sel, tau):
    """curr_sel: (B, S, D), pos_sel: (B, P, S, D) -> (B,) per-batch mean loss."""
    B, S, D = curr_sel.shape
    P = pos_sel.shape[1]
    out = pl.pallas_call(
        functools.partial(_contrast_kernel, tau=tau, sample_num=S),
        out_shape=jax.ShapeDtypeStruct((B, 128), jnp.float32),
        grid=(1,),
        in_specs=[pl.BlockSpec((B, S, D), lambda i: (0, 0, 0)),
                  pl.BlockSpec((B, P, S, D), lambda i: (0, 0, 0, 0))],
        out_specs=pl.BlockSpec((B, 128), lambda i: (0, 0)),
        compiler_params=pltpu.CompilerParams(dimension_semantics=("arbitrary",)),
    )(curr_sel, pos_sel)
    return out[:, 0]


# ----------------------------------------------------------------------------
# Forward: fully on-device (jit).
# ----------------------------------------------------------------------------
@functools.partial(jax.jit, static_argnames=("idx", "sample_num", "tau"))
def contrast5_forward(pred, proj_list, idx, pseudo_label, mask, sample_num=5,
                      tau=TAU):
    del pseudo_label, mask     # reference forward only uses mask.shape[0] == B
    B, C, H, W = pred.shape
    N = H * W
    Dp = proj_list[0].shape[1]

    # 1) fused uncertainty + top-k candidate selection (on device)
    sel_idx = select_top_uncertain(pred, sample_num)          # (B, S) int32

    # 2) gather selected pixels directly from the (B, D, N) layout
    idx_b = jnp.broadcast_to(sel_idx[:, None, :], (B, Dp, sample_num))
    curr_sel = None
    pos_sel = []
    for i, proj in enumerate(proj_list):
        sel = jnp.take_along_axis(proj.reshape(B, Dp, N), idx_b, axis=2)  # (B,D,S)
        sel = jnp.transpose(sel, (0, 2, 1))                               # (B,S,D)
        if i == idx:
            curr_sel = sel
        else:
            pos_sel.append(sel)
    pos_sel = jnp.stack(pos_sel, axis=1)              # (B, P, S, D)

    # 3) one single-step Pallas launch for all B contrastive losses
    losses = _contrast_losses(curr_sel, pos_sel, tau)
    return jnp.sum(losses) / B


# ----------------------------------------------------------------------------
# Pure-numpy reference (follows the torch code; float64 for the loss math).
# ----------------------------------------------------------------------------
def _reference_loss(pred, proj_list, idx, sample_num, tau):
    B, C, H, W = pred.shape
    N = H * W
    p32 = pred.astype(np.float32).reshape(B, C, N)
    unc = np.sum(p32 * np.log(p32 + np.float32(1e-6)), axis=1)     # (B, N)

    def l2norm(x, eps):
        return x / np.maximum(np.linalg.norm(x, axis=-1, keepdims=True), eps)

    projs = [p.astype(np.float64).transpose(0, 2, 3, 1).reshape(B, N, -1)
             for p in proj_list]
    curr = l2norm(projs[idx], 1e-12)
    pos = np.stack([l2norm(projs[i], 1e-12)
                    for i in range(len(projs)) if i != idx], axis=1)  # (B,P,N,D)

    def cos(a, b):
        num = np.sum(a * b, axis=-1)
        den = np.maximum(np.linalg.norm(a, axis=-1) * np.linalg.norm(b, axis=-1),
                         1e-8)
        return num / den

    total = 0.0
    for b in range(B):
        indices = np.argsort(-unc[b], kind="stable")[:sample_num]
        c = curr[b][indices]                          # (S, D)
        p = pos[b][:, indices]                        # (P, S, D)
        pos_e = np.exp(cos(c[None], p).sum(0) / tau)
        mat = np.exp(cos(c[:, None, :], c[None, :, :]) / tau)
        neg = mat.sum(axis=0) - np.diag(mat)
        total += np.mean(-np.log(pos_e / (pos_e + neg + 1e-8)))
    return total / B


if __name__ == "__main__":
    key = jax.random.PRNGKey(0)
    B, C, H, W, D = 2, 4, 16, 16, 32
    S = 5
    k1, k2, k3, k4, k5, k6 = jax.random.split(key, 6)

    pred = jax.nn.softmax(jax.random.normal(k1, (B, C, H, W), jnp.float32), axis=1)
    proj_list = [jax.random.normal(k, (B, D, H, W), jnp.float32)
                 for k in (k2, k3, k4)]
    pseudo_label = jax.random.randint(k5, (B, H, W), 0, C)
    mask = (jax.random.uniform(k6, (B, H, W)) > 0.5).astype(jnp.float32)

    # standalone check of the fused uncertainty + top-k kernel
    p32 = np.asarray(pred, np.float32).reshape(B, C, H * W)
    unc_ref = np.sum(p32 * np.log(p32 + np.float32(1e-6)), axis=1)
    ref_sel = np.argsort(-unc_ref, axis=1)[:, :S]
    sel = np.asarray(jax.block_until_ready(select_top_uncertain(pred, S)))
    for b in range(B):
        assert set(sel[b].tolist()) == set(ref_sel[b].tolist()), (sel[b], ref_sel[b])

    loss = contrast5_forward(pred, proj_list, idx=0, pseudo_label=pseudo_label,
                             mask=mask, sample_num=S)
    loss = jax.block_until_ready(loss)

    ref = _reference_loss(np.asarray(pred), [np.asarray(p) for p in proj_list],
                          idx=0, sample_num=S, tau=TAU)
    assert np.isfinite(float(loss))
    assert np.allclose(float(loss), ref, rtol=1e-3, atol=1e-4), (float(loss), ref)
    print("KERNEL_OK")
</pallas_src>

<mosaic_0001>
module attributes {stable_mosaic.version = 11 : i64} {
  func.func @_unc_topk_kernel(%arg0: i32, %arg1: i32, %arg2: memref<1x4x256xf32, #tpu.memory_space<vmem>>, %arg3: memref<1x1x128xf32, #tpu.memory_space<vmem>>, %arg4: memref<1x1x128xi32, #tpu.memory_space<vmem>>) attributes {dimension_semantics = [#tpu.dimension_semantics<parallel>, #tpu.dimension_semantics<parallel>], iteration_bounds = array<i64: 2, 1>, scalar_prefetch = 0 : i64, scratch_operands = 0 : i64, tpu.core_type = #tpu.core_type<tc>, window_params = [{transform_indices = @transform_0, window_bounds = array<i64: 1, 4, 256>}, {transform_indices = @transform_1, window_bounds = array<i64: 1, 1, 128>}, {transform_indices = @transform_2, window_bounds = array<i64: 1, 1, 128>}]} {
    %c256_i32 = arith.constant 256 : i32
    %0 = arith.muli %arg1, %c256_i32 : i32
    %c0 = arith.constant 0 : index
    %c0_0 = arith.constant 0 : index
    %c0_1 = arith.constant 0 : index
    %1 = vector.load %arg2[%c0, %c0_0, %c0_1] : memref<1x4x256xf32, #tpu.memory_space<vmem>>, vector<1x1x256xf32>
    %2 = vector.shape_cast %1 : vector<1x1x256xf32> to vector<256xf32>
    %cst = arith.constant 9.99999997E-7 : f32
    %3 = vector.broadcast %cst : f32 to vector<256xf32>
    %4 = arith.addf %2, %3 : vector<256xf32>
    %5 = math.log %4 : vector<256xf32>
    %6 = arith.mulf %2, %5 : vector<256xf32>
    %c0_2 = arith.constant 0 : index
    %c1 = arith.constant 1 : index
    %c0_3 = arith.constant 0 : index
    %7 = vector.load %arg2[%c0_2, %c1, %c0_3] : memref<1x4x256xf32, #tpu.memory_space<vmem>>, vector<1x1x256xf32>
    %8 = vector.shape_cast %7 : vector<1x1x256xf32> to vector<256xf32>
    %cst_4 = arith.constant 9.99999997E-7 : f32
    %9 = vector.broadcast %cst_4 : f32 to vector<256xf32>
    %10 = arith.addf %8, %9 : vector<256xf32>
    %11 = math.log %10 : vector<256xf32>
    %12 = arith.mulf %8, %11 : vector<256xf32>
    %13 = arith.addf %6, %12 : vector<256xf32>
    %c0_5 = arith.constant 0 : index
    %c2 = arith.constant 2 : index
    %c0_6 = arith.constant 0 : index
    %14 = vector.load %arg2[%c0_5, %c2, %c0_6] : memref<1x4x256xf32, #tpu.memory_space<vmem>>, vector<1x1x256xf32>
    %15 = vector.shape_cast %14 : vector<1x1x256xf32> to vector<256xf32>
    %cst_7 = arith.constant 9.99999997E-7 : f32
    %16 = vector.broadcast %cst_7 : f32 to vector<256xf32>
    %17 = arith.addf %15, %16 : vector<256xf32>
    %18 = math.log %17 : vector<256xf32>
    %19 = arith.mulf %15, %18 : vector<256xf32>
    %20 = arith.addf %13, %19 : vector<256xf32>
    %c0_8 = arith.constant 0 : index
    %c3 = arith.constant 3 : index
    %c0_9 = arith.constant 0 : index
    %21 = vector.load %arg2[%c0_8, %c3, %c0_9] : memref<1x4x256xf32, #tpu.memory_space<vmem>>, vector<1x1x256xf32>
    %22 = vector.shape_cast %21 : vector<1x1x256xf32> to vector<256xf32>
    %cst_10 = arith.constant 9.99999997E-7 : f32
    %23 = vector.broadcast %cst_10 : f32 to vector<256xf32>
    %24 = arith.addf %22, %23 : vector<256xf32>
    %25 = math.log %24 : vector<256xf32>
    %26 = arith.mulf %22, %25 : vector<256xf32>
    %27 = arith.addf %20, %26 : vector<256xf32>
    %28 = vector.shape_cast %27 : vector<256xf32> to vector<1x256xf32>
    %29 = tpu.iota {dimensions = array<i32: 1>} : vector<1x256xi32>
    %30 = vector.broadcast %0 : i32 to vector<1x256xi32>
    %31 = arith.addi %30, %29 : vector<1x256xi32>
    %c256_i32_11 = arith.constant 256 : i32
    %32 = vector.broadcast %c256_i32_11 : i32 to vector<1x256xi32>
    %33 = arith.cmpi slt, %31, %32 : vector<1x256xi32>
    %cst_12 = arith.constant 0xFF800000 : f32
    %34 = vector.broadcast %cst_12 : f32 to vector<1x256xf32>
    %35 = arith.select %33, %28, %34 : vector<1x256xi1>, vector<1x256xf32>
    %36 = tpu.iota {dimensions = array<i32: 1>} : vector<1x128xi32>
    %cst_13 = arith.constant 0xFF800000 : f32
    %37 = vector.broadcast %cst_13 : f32 to vector<1x128xf32>
    %c0_i32 = arith.constant 0 : i32
    %38 = vector.broadcast %c0_i32 : i32 to vector<1x128xi32>
    %cst_14 = arith.constant dense<0xFF800000> : vector<1xf32>
    %39 = vector.multi_reduction <maximumf>, %35, %cst_14 [1] : vector<1x256xf32> to vector<1xf32>
    %40 = vector.shape_cast %39 : vector<1xf32> to vector<1x1xf32>
    %41 = vector.broadcast %40 : vector<1x1xf32> to vector<1x256xf32>
    %42 = arith.cmpf oeq, %35, %41 : vector<1x256xf32>
    %c1073741824_i32 = arith.constant 1073741824 : i32
    %43 = vector.broadcast %c1073741824_i32 : i32 to vector<1x256xi32>
    %44 = arith.select %42, %31, %43 : vector<1x256xi1>, vector<1x256xi32>
    %cst_15 = arith.constant dense<2147483647> : vector<1xi32>
    %45 = vector.multi_reduction <minsi>, %44, %cst_15 [1] : vector<1x256xi32> to vector<1xi32>
    %46 = vector.shape_cast %45 : vector<1xi32> to vector<1x1xi32>
    %c255_i32 = arith.constant 255 : i32
    %47 = vector.broadcast %c255_i32 : i32 to vector<1x1xi32>
    %48 = arith.minsi %46, %47 : vector<1x1xi32>
    %c0_i32_16 = arith.constant 0 : i32
    %49 = vector.broadcast %c0_i32_16 : i32 to vector<1x128xi32>
    %50 = arith.cmpi eq, %36, %49 : vector<1x128xi32>
    %51 = vector.shape_cast %40 : vector<1x1xf32> to vector<1x1xf32>
    %52 = vector.broadcast %51 : vector<1x1xf32> to vector<1x128xf32>
    %53 = arith.select %50, %52, %37 : vector<1x128xi1>, vector<1x128xf32>
    %c0_i32_17 = arith.constant 0 : i32
    %54 = vector.broadcast %c0_i32_17 : i32 to vector<1x128xi32>
    %55 = arith.cmpi eq, %36, %54 : vector<1x128xi32>
    %56 = vector.shape_cast %48 : vector<1x1xi32> to vector<1x1xi32>
    %57 = vector.broadcast %56 : vector<1x1xi32> to vector<1x128xi32>
    %58 = arith.select %55, %57, %38 : vector<1x128xi1>, vector<1x128xi32>
    %59 = vector.broadcast %48 : vector<1x1xi32> to vector<1x256xi32>
    %60 = arith.cmpi eq, %31, %59 : vector<1x256xi32>
    %cst_18 = arith.constant 0xFF800000 : f32
    %61 = vector.broadcast %cst_18 : f32 to vector<1x256xf32>
    %62 = arith.select %60, %61, %35 : vector<1x256xi1>, vector<1x256xf32>
    %cst_19 = arith.constant dense<0xFF800000> : vector<1xf32>
    %63 = vector.multi_reduction <maximumf>, %62, %cst_19 [1] : vector<1x256xf32> to vector<1xf32>
    %64 = vector.shape_cast %63 : vector<1xf32> to vector<1x1xf32>
    %65 = vector.broadcast %64 : vector<1x1xf32> to vector<1x256xf32>
    %66 = arith.cmpf oeq, %62, %65 : vector<1x256xf32>
    %c1073741824_i32_20 = arith.constant 1073741824 : i32
    %67 = vector.broadcast %c1073741824_i32_20 : i32 to vector<1x256xi32>
    %68 = arith.select %66, %31, %67 : vector<1x256xi1>, vector<1x256xi32>
    %cst_21 = arith.constant dense<2147483647> : vector<1xi32>
    %69 = vector.multi_reduction <minsi>, %68, %cst_21 [1] : vector<1x256xi32> to vector<1xi32>
    %70 = vector.shape_cast %69 : vector<1xi32> to vector<1x1xi32>
    %c255_i32_22 = arith.constant 255 : i32
    %71 = vector.broadcast %c255_i32_22 : i32 to vector<1x1xi32>
    %72 = arith.minsi %70, %71 : vector<1x1xi32>
    %c1_i32 = arith.constant 1 : i32
    %73 = vector.broadcast %c1_i32 : i32 to vector<1x128xi32>
    %74 = arith.cmpi eq, %36, %73 : vector<1x128xi32>
    %75 = vector.shape_cast %64 : vector<1x1xf32> to vector<1x1xf32>
    %76 = vector.broadcast %75 : vector<1x1xf32> to vector<1x128xf32>
    %77 = arith.select %74, %76, %53 : vector<1x128xi1>, vector<1x128xf32>
    %c1_i32_23 = arith.constant 1 : i32
    %78 = vector.broadcast %c1_i32_23 : i32 to vector<1x128xi32>
    %79 = arith.cmpi eq, %36, %78 : vector<1x128xi32>
    %80 = vector.shape_cast %72 : vector<1x1xi32> to vector<1x1xi32>
    %81 = vector.broadcast %80 : vector<1x1xi32> to vector<1x128xi32>
    %82 = arith.select %79, %81, %58 : vector<1x128xi1>, vector<1x128xi32>
    %83 = vector.broadcast %72 : vector<1x1xi32> to vector<1x256xi32>
    %84 = arith.cmpi eq, %31, %83 : vector<1x256xi32>
    %cst_24 = arith.constant 0xFF800000 : f32
    %85 = vector.broadcast %cst_24 : f32 to vector<1x256xf32>
    %86 = arith.select %84, %85, %62 : vector<1x256xi1>, vector<1x256xf32>
    %cst_25 = arith.constant dense<0xFF800000> : vector<1xf32>
    %87 = vector.multi_reduction <maximumf>, %86, %cst_25 [1] : vector<1x256xf32> to vector<1xf32>
    %88 = vector.shape_cast %87 : vector<1xf32> to vector<1x1xf32>
    %89 = vector.broadcast %88 : vector<1x1xf32> to vector<1x256xf32>
    %90 = arith.cmpf oeq, %86, %89 : vector<1x256xf32>
    %c1073741824_i32_26 = arith.constant 1073741824 : i32
    %91 = vector.broadcast %c1073741824_i32_26 : i32 to vector<1x256xi32>
    %92 = arith.select %90, %31, %91 : vector<1x256xi1>, vector<1x256xi32>
    %cst_27 = arith.constant dense<2147483647> : vector<1xi32>
    %93 = vector.multi_reduction <minsi>, %92, %cst_27 [1] : vector<1x256xi32> to vector<1xi32>
    %94 = vector.shape_cast %93 : vector<1xi32> to vector<1x1xi32>
    %c255_i32_28 = arith.constant 255 : i32
    %95 = vector.broadcast %c255_i32_28 : i32 to vector<1x1xi32>
    %96 = arith.minsi %94, %95 : vector<1x1xi32>
    %c2_i32 = arith.constant 2 : i32
    %97 = vector.broadcast %c2_i32 : i32 to vector<1x128xi32>
    %98 = arith.cmpi eq, %36, %97 : vector<1x128xi32>
    %99 = vector.shape_cast %88 : vector<1x1xf32> to vector<1x1xf32>
    %100 = vector.broadcast %99 : vector<1x1xf32> to vector<1x128xf32>
    %101 = arith.select %98, %100, %77 : vector<1x128xi1>, vector<1x128xf32>
    %c2_i32_29 = arith.constant 2 : i32
    %102 = vector.broadcast %c2_i32_29 : i32 to vector<1x128xi32>
    %103 = arith.cmpi eq, %36, %102 : vector<1x128xi32>
    %104 = vector.shape_cast %96 : vector<1x1xi32> to vector<1x1xi32>
    %105 = vector.broadcast %104 : vector<1x1xi32> to vector<1x128xi32>
    %106 = arith.select %103, %105, %82 : vector<1x128xi1>, vector<1x128xi32>
    %107 = vector.broadcast %96 : vector<1x1xi32> to vector<1x256xi32>
    %108 = arith.cmpi eq, %31, %107 : vector<1x256xi32>
    %cst_30 = arith.constant 0xFF800000 : f32
    %109 = vector.broadcast %cst_30 : f32 to vector<1x256xf32>
    %110 = arith.select %108, %109, %86 : vector<1x256xi1>, vector<1x256xf32>
    %cst_31 = arith.constant dense<0xFF800000> : vector<1xf32>
    %111 = vector.multi_reduction <maximumf>, %110, %cst_31 [1] : vector<1x256xf32> to vector<1xf32>
    %112 = vector.shape_cast %111 : vector<1xf32> to vector<1x1xf32>
    %113 = vector.broadcast %112 : vector<1x1xf32> to vector<1x256xf32>
    %114 = arith.cmpf oeq, %110, %113 : vector<1x256xf32>
    %c1073741824_i32_32 = arith.constant 1073741824 : i32
    %115 = vector.broadcast %c1073741824_i32_32 : i32 to vector<1x256xi32>
    %116 = arith.select %114, %31, %115 : vector<1x256xi1>, vector<1x256xi32>
    %cst_33 = arith.constant dense<2147483647> : vector<1xi32>
    %117 = vector.multi_reduction <minsi>, %116, %cst_33 [1] : vector<1x256xi32> to vector<1xi32>
    %118 = vector.shape_cast %117 : vector<1xi32> to vector<1x1xi32>
    %c255_i32_34 = arith.constant 255 : i32
    %119 = vector.broadcast %c255_i32_34 : i32 to vector<1x1xi32>
    %120 = arith.minsi %118, %119 : vector<1x1xi32>
    %c3_i32 = arith.constant 3 : i32
    %121 = vector.broadcast %c3_i32 : i32 to vector<1x128xi32>
    %122 = arith.cmpi eq, %36, %121 : vector<1x128xi32>
    %123 = vector.shape_cast %112 : vector<1x1xf32> to vector<1x1xf32>
    %124 = vector.broadcast %123 : vector<1x1xf32> to vector<1x128xf32>
    %125 = arith.select %122, %124, %101 : vector<1x128xi1>, vector<1x128xf32>
    %c3_i32_35 = arith.constant 3 : i32
    %126 = vector.broadcast %c3_i32_35 : i32 to vector<1x128xi32>
    %127 = arith.cmpi eq, %36, %126 : vector<1x128xi32>
    %128 = vector.shape_cast %120 : vector<1x1xi32> to vector<1x1xi32>
    %129 = vector.broadcast %128 : vector<1x1xi32> to vector<1x128xi32>
    %130 = arith.select %127, %129, %106 : vector<1x128xi1>, vector<1x128xi32>
    %131 = vector.broadcast %120 : vector<1x1xi32> to vector<1x256xi32>
    %132 = arith.cmpi eq, %31, %131 : vector<1x256xi32>
    %cst_36 = arith.constant 0xFF800000 : f32
    %133 = vector.broadcast %cst_36 : f32 to vector<1x256xf32>
    %134 = arith.select %132, %133, %110 : vector<1x256xi1>, vector<1x256xf32>
    %cst_37 = arith.constant dense<0xFF800000> : vector<1xf32>
    %135 = vector.multi_reduction <maximumf>, %134, %cst_37 [1] : vector<1x256xf32> to vector<1xf32>
    %136 = vector.shape_cast %135 : vector<1xf32> to vector<1x1xf32>
    %137 = vector.broadcast %136 : vector<1x1xf32> to vector<1x256xf32>
    %138 = arith.cmpf oeq, %134, %137 : vector<1x256xf32>
    %c1073741824_i32_38 = arith.constant 1073741824 : i32
    %139 = vector.broadcast %c1073741824_i32_38 : i32 to vector<1x256xi32>
    %140 = arith.select %138, %31, %139 : vector<1x256xi1>, vector<1x256xi32>
    %cst_39 = arith.constant dense<2147483647> : vector<1xi32>
    %141 = vector.multi_reduction <minsi>, %140, %cst_39 [1] : vector<1x256xi32> to vector<1xi32>
    %142 = vector.shape_cast %141 : vector<1xi32> to vector<1x1xi32>
    %c255_i32_40 = arith.constant 255 : i32
    %143 = vector.broadcast %c255_i32_40 : i32 to vector<1x1xi32>
    %144 = arith.minsi %142, %143 : vector<1x1xi32>
    %c4_i32 = arith.constant 4 : i32
    %145 = vector.broadcast %c4_i32 : i32 to vector<1x128xi32>
    %146 = arith.cmpi eq, %36, %145 : vector<1x128xi32>
    %147 = vector.shape_cast %136 : vector<1x1xf32> to vector<1x1xf32>
    %148 = vector.broadcast %147 : vector<1x1xf32> to vector<1x128xf32>
    %149 = arith.select %146, %148, %125 : vector<1x128xi1>, vector<1x128xf32>
    %c4_i32_41 = arith.constant 4 : i32
    %150 = vector.broadcast %c4_i32_41 : i32 to vector<1x128xi32>
    %151 = arith.cmpi eq, %36, %150 : vector<1x128xi32>
    %152 = vector.shape_cast %144 : vector<1x1xi32> to vector<1x1xi32>
    %153 = vector.broadcast %152 : vector<1x1xi32> to vector<1x128xi32>
    %154 = arith.select %151, %153, %130 : vector<1x128xi1>, vector<1x128xi32>
    %155 = vector.shape_cast %149 : vector<1x128xf32> to vector<1x1x128xf32>
    %c0_42 = arith.constant 0 : index
    %c0_43 = arith.constant 0 : index
    %c0_44 = arith.constant 0 : index
    %156 = vector.load %arg3[%c0_42, %c0_43, %c0_44] : memref<1x1x128xf32, #tpu.memory_space<vmem>>, vector<1x1x128xf32>
    tpu.vector_store %arg3[%c0_42, %c0_43, %c0_44], %155 {strides = array<i32>} : memref<1x1x128xf32, #tpu.memory_space<vmem>>, vector<1x1x128xf32>,
    %157 = vector.shape_cast %154 : vector<1x128xi32> to vector<1x1x128xi32>
    %c0_45 = arith.constant 0 : index
    %c0_46 = arith.constant 0 : index
    %c0_47 = arith.constant 0 : index
    %158 = vector.load %arg4[%c0_45, %c0_46, %c0_47] : memref<1x1x128xi32, #tpu.memory_space<vmem>>, vector<1x1x128xi32>
    tpu.vector_store %arg4[%c0_45, %c0_46, %c0_47], %157 {strides = array<i32>} : memref<1x1x128xi32, #tpu.memory_space<vmem>>, vector<1x1x128xi32>,
    return
  }
  func.func @transform_0(%arg0: i32, %arg1: i32) -> (i32, i32, i32) {
    %c0_i32 = arith.constant 0 : i32
    %c0_i32_0 = arith.constant 0 : i32
    return %arg0, %c0_i32, %arg1 : i32, i32, i32
  }
  func.func @transform_1(%arg0: i32, %arg1: i32) -> (i32, i32, i32) {
    %c0_i32 = arith.constant 0 : i32
    %c0_i32_0 = arith.constant 0 : i32
    return %arg0, %c0_i32, %arg1 : i32, i32, i32
  }
  func.func @transform_2(%arg0: i32, %arg1: i32) -> (i32, i32, i32) {
    %c0_i32 = arith.constant 0 : i32
    %c0_i32_0 = arith.constant 0 : i32
    return %arg0, %c0_i32, %arg1 : i32, i32, i32
  }
}

</mosaic_0001>

<bundles_post_ra>
// kernel: tpu_custom_call.1
= control target key start
LH: loop header
LB: loop body
LE: loop exit
PB: predicated region body
PF: predicated region fallthrough
CT: control target
= control target key end

     0   :  { %8 = vsyncpa [#allocation3], 0  ;;  %s1022_s0 = inlined_call_operand.hbm [shape: f32[2,4,256], index: 0, kind: input, shape index: {}]   ;;  %s1023_s1 = inlined_call_operand.hbm [shape: f32[2,1,128], index: 1, kind: output, shape index: {0}]   ;;  %s1024_s2 = inlined_call_operand.hbm [shape: s32[2,1,128], index: 2, kind: output, shape index: {1}]  }
   0x1   :  { %10 = vsyncpa [#allocation3 + $0x1], 0 }
   0x2   :  { %11 = vsyncpa [#allocation4], 0 }
   0x3   :  { %13 = vsyncpa [#allocation4 + $0x1], 0 }
   0x4   :  { %14 = vsyncpa [#allocation7], 0 }
   0x5   :  { %16 = vsyncpa [#allocation7 + $0x1], 0  ;;  %s803_s9 = smov 0   ;;  %s805_s10 = smov 0  }
   0x6   :  { %s807_s11 = smov 0   ;;  %s809_s12 = smov 0  }
   0x7   :  { %s811_s13 = smov 0   ;;  %s813_s14 = smov 0  }
   0x8 LB: > { %s552_s15 = sadd.s32 4294967295, %s786_s14   ;;  %s553_s16 = sadd.s32 4294967294, %s786_s14   ;;  %s786_s14 = sphi %s813_s14, %s22_s14   ;;  %s782_s13 = sphi %s811_s13, %s1033_s13   ;;  %s778_s12 = sphi %s809_s12, %s1032_s12   ;;  %s774_s11 = sphi %s807_s11, %s1031_s11   ;;  %s770_s10 = sphi %s805_s10, %s1030_s10   ;;  %s766_s9 = sphi %s803_s9, %s1029_s9  }
   0x9   : > { %s34_s17 = sadd.s32 1, %s782_s13  ;;  %s43_s18 = sadd.s32 1, %s774_s11 }
   0xa   : > { %p36_p0 = scmp.ge.s32.totalorder %s34_s17, 2  ;;  %p50_p1 = scmp.ne.s32.totalorder %s774_s11, %s770_s10 }
   0xb   : > { %p51_p2 = scmp.eq.s32.totalorder %s786_s14, 0  ;;  %p56_p3 = scmp.ne.s32.totalorder %s770_s10, %s766_s9 }
   0xc   : > { %s1035_s17 = smov (%p36_p0, %s34_s17), 0  ;;  %p57_p5 = scmp.eq.s32.totalorder %s552_s15, 0 }
   0xd   : > { %p844_p4 = por %p51_p2, %p50_p1  ;;  %s38_s20 = ssub.s32 %s782_s13, %s1035_s17 }
   0xe   : > { %p82_p6 = scmp.eq.s32.totalorder %s552_s15, 1  ;;  %p41_p7 = scmp.eq.s32.totalorder %s38_s20, 0 }
   0xf   : > { %p850_p8 = por %p57_p5, %p56_p3  ;;  %p88_p10 = scmp.eq.s32.totalorder %s553_s16, 1 }
  0x10   : > { %p854_p9 = por %p82_p6, %p50_p1  ;;  %p555_p12 = scmp.ge.s32.totalorder %s786_s14, 2 }
  0x11   : > { %s859_s23 = scalar_select %p41_p7, %s774_s11, %s43_s18  }
  0x12   : > { %p861_p11 = por %p88_p10, %p56_p3  ;;  %p584_p13 = scmp.lt.s32.totalorder %s786_s14, 2 }
  0x13   : > { %s136_s25 = sand.u32 1, %s774_s11   ;;  %s566_s27 = sshll.u32 %s782_s13, 3 }
  0x14   : > { %s556_s26 = sshll.u32 %s136_s25, 3  ;;  %s147_s30 = scalar_lea.hbm %s1022_s0, %s566_s27 }
  0x15   : > { %s140_s3 = scalar_lea.vmem [#allocation2], %s556_s26  ;;  %s149_s5 = sshll.u32 %s147_s30, 4  ;;  %s150_s5 = int_to_ptr.hbm [resolvable:$true] %s149_s5 }
  0x16   : > { %s151_s4 = sshll.u32 %s140_s3, 4  ;;  %p574_p0 = pnand %p584_p13, %p844_p4  ;;  %s152_s4 = int_to_ptr.vmem [resolvable:$true] %s151_s4 }
  0x17   : > { %p559_p1 = scmp.ge.s32.totalorder %s786_s14, 1  ;;  %p156_p2 = scmp.lt.s32.totalorder %s786_s14, 3 }
  0x18   : > { %s137_s6 = scalar_lea.sflag [#allocation3], %s136_s25 }
  0x19   : > { %576 = dma.hbm_to_vmem [thread:$0]  (!%p574_p0), %s150_s5, 128, %s152_s4, %s137_s6  }
  0x1a   : > { %p157_p3 = pnand %p559_p1, %p156_p2 }
  0x1b   : > { %s877_s7 = sand.u32 (!%p157_p3), 1, %s770_s10  }
  0x1c   : > { %160 = sbr.rel (%p157_p3) target bundleno = 1910 (0x776), region = 24  ;;  %s560_s8 = sshll.u32 (!%p157_p3), %s877_s7, 3 }
  0x1d   : > { %s163_s15 = scalar_lea.sflag (!%p157_p3), [#allocation3], %s877_s7  ;;  %s166_s16 = scalar_lea.vmem (!%p157_p3), [#allocation2], %s560_s8 }
  0x21   : > { %753 = dma.done.wait (%p850_p8), %s163_s15, 128  }
  0x22   : > { %755 = vsyncadd (%p850_p8), %s163_s15, 4294967168  ;;  %v193_v0 = vld [vmem:[%s166_s16] ss:$4 sm:$0x3]  ;;  %vm234_vm0 = vcmask 1040384   ;;  %v219_v28 = vlaneseq  ;;  %s184_s18 = scalar_lea.vmem [#allocation5], %s877_s7  ;;  %s427_s21 = scalar_lea.hbm %s1023_s1, %s778_s12 }
  0x23   : > { %v561_v1 = vld [vmem:[%s166_s16 + $0x1] ss:$4 sm:$0x3]  ;;  %v194_v2 = vadd.f32 1e-06, %v193_v0  ;;  %s429_s25 = sshll.u32 %s184_s18, 4  ;;  %s430_s25 = int_to_ptr.vmem [resolvable:$true] %s429_s25 }
  0x24   : > { %v200_v3 = vadd.f32 1e-06, %v561_v1  ;;  %v562_v4 = vld [vmem:[%s166_s16 + $0x2] ss:$4 sm:$0x3]  ;;  %v887_v29 = vand.u32 127, %v219_v28 }
  0x25   : > { %v563_v5 = vld [vmem:[%s166_s16 + $0x3] ss:$4 sm:$0x3]  ;;  %634 = vlog2.f32 %v194_v2  ;;  %v207_v6 = vadd.f32 1e-06, %v562_v4  ;;  %s431_s26 = sshll.u32 %s427_s21, 4  ;;  %s432_s26 = int_to_ptr.hbm [resolvable:$true] %s431_s26 }
  0x26   : > { %v214_v7 = vadd.f32 1e-06, %v563_v5  ;;  %636 = vlog2.f32 %v200_v3  ;;  %v890_v30 = vadd.s32 128, %v887_v29  ;;  %vm264_vm12 = vcmp.eq.s32.totalorder %v887_v29, 0  ;;  %s414_s27 = scalar_lea.sflag [#allocation4], %s877_s7  ;;  %s686_s28 = sshra.s32 %s432_s26, 4  ;;  %s687_s28 = int_to_ptr.hbm [resolvable:$true] %s686_s28 }
  0x27   : > { %638 = vlog2.f32 %v207_v6  ;;  %vm300_vm14 = vcmp.eq.s32.totalorder %v887_v29, 1  ;;  %s688_s29 = scalar_lea.hbm %s687_s28, 1  ;;  %s692_s4 = scalar_lea.hbm %s1023_s1, 2 }
  0x28   : > { %640 = vlog2.f32 %v214_v7  ;;  %p689_p4 = scmp.ne.s32.totalorder %s687_s28, %s688_s29  ;;  %p693_p7 = scmp.lt.s32.totalorder %s687_s28, %s1023_s1 }
  0x29   : > { %p694_p8 = scmp.lt.s32.totalorder %s692_s4, %s688_s29 }
  0x2a   : > { %p690_p5 = pnand %p689_p4, %p854_p9 }
  0x2b   : > { %v635_v8 = vpop.eup %634  ;;  %p695_p10 = por %p694_p8, %p693_p7 }
  0x2c   : > { %v637_v9 = vpop.eup %636  ;;  %v196_v10 = vmul.f32 0.6931472, %v635_v8  ;;  %p691_p6 = pneg %p690_p5 }
  0x2d   : > { %v639_v11 = vpop.eup %638  ;;  %v202_v12 = vmul.f32 0.6931472, %v637_v9 }
  0x2e   : > { %v641_v13 = vpop.eup %640  ;;  %v197_v14 = vmul.f32 %v196_v10, %v193_v0  ;;  %v209_v15 = vmul.f32 0.6931472, %v639_v11  ;;  %p696_p13 = pnand %p695_p10, %p691_p6 }
  0x2f   : > { %v203_v16 = vmul.f32 %v561_v1, %v202_v12  ;;  %v216_v17 = vmul.f32 0.6931472, %v641_v13 }
  0x30   : > { %v210_v18 = vmul.f32 %v562_v4, %v209_v15 }
  0x31   : > { %v204_v19 = vadd.f32 %v203_v16, %v197_v14  ;;  %v217_v20 = vmul.f32 %v563_v5, %v216_v17 }
  0x33   : > { %v211_v21 = vadd.f32 %v210_v18, %v204_v19 }
  0x35   : > { %v218_v22 = vadd.f32 %v217_v20, %v211_v21 }
  0x37   : > { %v228_v23 = vperm.slane %v218_v22, 0  ;;  %v229_v24 = vperm.slane %v218_v22, 1 }
  0x39   : > { %v235_v25 = vsel %vm234_vm0, %v228_v23, -inf  ;;  %v236_v26 = vsel %vm234_vm0, %v229_v24, -inf }
  0x3a   : > { %v237_v27 = vmax.f32 %v235_v25, %v236_v26 }
  0x3c   : > { %238 = vmax.xlane.f32.xlu0 %v237_v27 }
  0xaf   : > { %v892_v31 = vpop.xlane.xlu0 %238 }
  0xb0   : > { %vm240_vm1 = vcmp.eq.f32.partialorder %v228_v23, %v892_v31  ;;  %vm241_vm2 = vcmp.eq.f32.partialorder %v229_v24, %v892_v31 }
  0xb1   : > { %v242_v32 = vsel %vm240_vm1, %v887_v29, 1073741824  ;;  %v243_v33 = vsel %vm241_vm2, %v890_v30, 1073741824 }
  0xb2   : > { %v244_v34 = vsel %vm234_vm0, %v242_v32, 2147483647  ;;  %v245_v35 = vsel %vm234_vm0, %v243_v33, 2147483647 }
  0xb3   : > { %vm246_vm3 = vcmp.lt.s32.totalorder %v244_v34, %v245_v35 }
  0xb4   : > { %v247_v36 = vsel %vm246_vm3, %v244_v34, %v245_v35 }
  0xb5   : > { %v249_v37 = vshra.s32 %v247_v36, 16  ;;  %v248_v39 = vand.u32 65535, %v247_v36 }
  0xb7   : > { %v251_v38 = vcvt.s32.f32 %v249_v37  ;;  %v250_v41 = vcvt.s32.f32 %v248_v39 }
  0xb9   : > { %252 = vmin.xlane.f32.xlu0 %v251_v38 }
 0x12c   : > { %v253_v40 = vpop.xlane.xlu0 %252 }
 0x12d   : > { %vm254_vm4 = vcmp.eq.f32.partialorder %v251_v38, %v253_v40  ;;  %v259_v43 = vcvt.f32.s32 %v253_v40 }
 0x12e   : > { %v255_v42 = vsel %vm254_vm4, %v250_v41, inf }
 0x12f   : > { %256 = vmin.xlane.f32.xlu1 %v255_v42  ;;  %v260_v45 = vshll.u32 %v259_v43, 16 }
 0x1a2   : > { %v257_v44 = vpop.xlane.xlu1 %256 }
 0x1a3   : > { %v258_v46 = vcvt.f32.s32 %v257_v44 }
 0x1a5   : > { %v261_v47 = vadd.s32 %v260_v45, %v258_v46 }
 0x1a7   : > { %vm262_vm5 = vcmp.lt.s32.totalorder %v261_v47, 255 }
 0x1a8   : > { %v263_v48 = vsel %vm262_vm5, %v261_v47, 255 }
 0x1a9   : > { %vm267_vm6 = vcmp.eq.s32.totalorder %v887_v29, %v263_v48  ;;  %vm268_vm7 = vcmp.eq.s32.totalorder %v890_v30, %v263_v48  ;;  %v266_v7 = vsel %vm264_vm12, %v263_v48, 0 }
 0x1aa   : > { %v269_v49 = vsel %vm267_vm6, -inf, %v228_v23  ;;  %v270_v50 = vsel %vm268_vm7, -inf, %v229_v24  ;;  %vm336_vm7 = vcmp.eq.s32.totalorder %v887_v29, 2 }
 0x1ab   : > { %v271_v51 = vsel %vm234_vm0, %v269_v49, -inf  ;;  %v272_v52 = vsel %vm234_vm0, %v270_v50, -inf }
 0x1ac   : > { %v273_v53 = vmax.f32 %v271_v51, %v272_v52 }
 0x1ae   : > { %274 = vmax.xlane.f32.xlu1 %v273_v53 }
 0x221   : > { %v904_v54 = vpop.xlane.xlu1 %274 }
 0x222   : > { %vm276_vm8 = vcmp.eq.f32.partialorder %v269_v49, %v904_v54  ;;  %vm277_vm9 = vcmp.eq.f32.partialorder %v270_v50, %v904_v54 }
 0x223   : > { %v278_v55 = vsel %vm276_vm8, %v887_v29, 1073741824  ;;  %v279_v56 = vsel %vm277_vm9, %v890_v30, 1073741824 }
 0x224   : > { %v280_v57 = vsel %vm234_vm0, %v278_v55, 2147483647  ;;  %v281_v58 = vsel %vm234_vm0, %v279_v56, 2147483647 }
 0x225   : > { %vm282_vm10 = vcmp.lt.s32.totalorder %v280_v57, %v281_v58 }
 0x226   : > { %v283_v59 = vsel %vm282_vm10, %v280_v57, %v281_v58 }
 0x227   : > { %v285_v60 = vshra.s32 %v283_v59, 16  ;;  %v284_v62 = vand.u32 65535, %v283_v59 }
 0x229   : > { %v287_v61 = vcvt.s32.f32 %v285_v60  ;;  %v286_v0 = vcvt.s32.f32 %v284_v62 }
 0x22b   : > { %288 = vmin.xlane.f32.xlu2 %v287_v61 }
 0x29e   : > { %v289_v63 = vpop.xlane.xlu2 %288 }
 0x29f   : > { %vm290_vm11 = vcmp.eq.f32.partialorder %v287_v61, %v289_v63  ;;  %v295_v2 = vcvt.f32.s32 %v289_v63 }
 0x2a0   : > { %v291_v1 = vsel %vm290_vm11, %v286_v0, inf }
 0x2a1   : > { %292 = vmin.xlane.f32.xlu2 %v291_v1  ;;  %v296_v4 = vshll.u32 %v295_v2, 16 }
 0x314   : > { %v293_v3 = vpop.xlane.xlu2 %292 }
 0x315   : > { %v294_v5 = vcvt.f32.s32 %v293_v3  ;;  %v265_v3 = vsel %vm264_vm12, %v892_v31, -inf }
 0x317   : > { %v297_v6 = vadd.s32 %v296_v4, %v294_v5  ;;  %v301_v4 = vsel %vm300_vm14, %v904_v54, %v265_v3 }
 0x319   : > { %vm298_vm13 = vcmp.lt.s32.totalorder %v297_v6, 255 }
 0x31a   : > { %v299_v8 = vsel %vm298_vm13, %v297_v6, 255 }
 0x31b   : > { %v302_v9 = vsel %vm300_vm14, %v299_v8, %v266_v7  ;;  %vm303_vm15 = vcmp.eq.s32.totalorder %v887_v29, %v299_v8  ;;  %vm304_vm1 = vcmp.eq.s32.totalorder %v890_v30, %v299_v8 }
 0x31c   : > { %v305_v10 = vsel %vm303_vm15, -inf, %v269_v49  ;;  %v306_v11 = vsel %vm304_vm1, -inf, %v270_v50 }
 0x31d   : > { %v307_v12 = vsel %vm234_vm0, %v305_v10, -inf  ;;  %v308_v13 = vsel %vm234_vm0, %v306_v11, -inf }
 0x31e   : > { %v309_v14 = vmax.f32 %v307_v12, %v308_v13 }
 0x320   : > { %310 = vmax.xlane.f32.xlu0 %v309_v14 }
 0x393   : > { %v922_v15 = vpop.xlane.xlu0 %310 }
 0x394   : > { %vm312_vm2 = vcmp.eq.f32.partialorder %v305_v10, %v922_v15  ;;  %vm313_vm3 = vcmp.eq.f32.partialorder %v306_v11, %v922_v15  ;;  %v337_v5 = vsel %vm336_vm7, %v922_v15, %v301_v4 }
 0x395   : > { %v314_v16 = vsel %vm312_vm2, %v887_v29, 1073741824  ;;  %v315_v17 = vsel %vm313_vm3, %v890_v30, 1073741824  ;;  %vm372_vm2 = vcmp.eq.s32.totalorder %v887_v29, 3 }
 0x396   : > { %v316_v18 = vsel %vm234_vm0, %v314_v16, 2147483647  ;;  %v317_v19 = vsel %vm234_vm0, %v315_v17, 2147483647 }
 0x397   : > { %vm318_vm4 = vcmp.lt.s32.totalorder %v316_v18, %v317_v19 }
 0x398   : > { %v319_v20 = vsel %vm318_vm4, %v316_v18, %v317_v19 }
 0x399   : > { %v321_v21 = vshra.s32 %v319_v20, 16  ;;  %v320_v23 = vand.u32 65535, %v319_v20 }
 0x39b   : > { %v323_v22 = vcvt.s32.f32 %v321_v21  ;;  %v322_v25 = vcvt.s32.f32 %v320_v23 }
 0x39d   : > { %324 = vmin.xlane.f32.xlu1 %v323_v22 }
 0x410   : > { %v325_v24 = vpop.xlane.xlu1 %324 }
 0x411   : > { %vm326_vm5 = vcmp.eq.f32.partialorder %v323_v22, %v325_v24  ;;  %v331_v27 = vcvt.f32.s32 %v325_v24 }
 0x412   : > { %v327_v26 = vsel %vm326_vm5, %v322_v25, inf  ;;  %vm408_vm5 = vcmp.eq.s32.totalorder %v887_v29, 4 }
 0x413   : > { %328 = vmin.xlane.f32.xlu2 %v327_v26  ;;  %v332_v32 = vshll.u32 %v331_v27, 16 }
 0x486   : > { %v329_v28 = vpop.xlane.xlu2 %328 }
 0x487   : > { %v330_v33 = vcvt.f32.s32 %v329_v28 }
 0x489   : > { %v333_v34 = vadd.s32 %v332_v32, %v330_v33 }
 0x48b   : > { %vm334_vm6 = vcmp.lt.s32.totalorder %v333_v34, 255 }
 0x48c   : > { %v335_v35 = vsel %vm334_vm6, %v333_v34, 255 }
 0x48d   : > { %v338_v36 = vsel %vm336_vm7, %v335_v35, %v302_v9  ;;  %vm339_vm8 = vcmp.eq.s32.totalorder %v887_v29, %v335_v35  ;;  %vm340_vm9 = vcmp.eq.s32.totalorder %v890_v30, %v335_v35 }
 0x48e   : > { %v341_v37 = vsel %vm339_vm8, -inf, %v305_v10  ;;  %v342_v38 = vsel %vm340_vm9, -inf, %v306_v11 }
 0x48f   : > { %v343_v39 = vsel %vm234_vm0, %v341_v37, -inf  ;;  %v344_v40 = vsel %vm234_vm0, %v342_v38, -inf }
 0x490   : > { %v345_v41 = vmax.f32 %v343_v39, %v344_v40 }
 0x492   : > { %346 = vmax.xlane.f32.xlu0 %v345_v41 }
 0x505   : > { %v347_v42 = vpop.xlane.xlu0 %346 }
 0x506   : > { %vm348_vm10 = vcmp.eq.f32.partialorder %v341_v37, %v347_v42  ;;  %vm349_vm11 = vcmp.eq.f32.partialorder %v342_v38, %v347_v42  ;;  %v373_v6 = vsel %vm372_vm2, %v347_v42, %v337_v5 }
 0x507   : > { %v350_v43 = vsel %vm348_vm10, %v887_v29, 1073741824  ;;  %v351_v44 = vsel %vm349_vm11, %v890_v30, 1073741824 }
 0x508   : > { %v352_v45 = vsel %vm234_vm0, %v350_v43, 2147483647  ;;  %v353_v46 = vsel %vm234_vm0, %v351_v44, 2147483647 }
 0x509   : > { %vm354_vm13 = vcmp.lt.s32.totalorder %v352_v45, %v353_v46 }
 0x50a   : > { %v355_v47 = vsel %vm354_vm13, %v352_v45, %v353_v46 }
 0x50b   : > { %v357_v48 = vshra.s32 %v355_v47, 16  ;;  %v356_v50 = vand.u32 65535, %v355_v47 }
 0x50d   : > { %v359_v49 = vcvt.s32.f32 %v357_v48  ;;  %v358_v52 = vcvt.s32.f32 %v356_v50 }
 0x50f   : > { %360 = vmin.xlane.f32.xlu1 %v359_v49 }
 0x582   : > { %v361_v51 = vpop.xlane.xlu1 %360 }
 0x583   : > { %vm362_vm15 = vcmp.eq.f32.partialorder %v359_v49, %v361_v51  ;;  %v367_v55 = vcvt.f32.s32 %v361_v51 }
 0x584   : > { %v363_v53 = vsel %vm362_vm15, %v358_v52, inf }
 0x585   : > { %364 = vmin.xlane.f32.xlu2 %v363_v53  ;;  %v368_v57 = vshll.u32 %v367_v55, 16 }
 0x5f8   : > { %v365_v56 = vpop.xlane.xlu2 %364 }
 0x5f9   : > { %v366_v58 = vcvt.f32.s32 %v365_v56 }
 0x5fb   : > { %v369_v59 = vadd.s32 %v368_v57, %v366_v58 }
 0x5fd   : > { %vm370_vm1 = vcmp.lt.s32.totalorder %v369_v59, 255 }
 0x5fe   : > { %v371_v60 = vsel %vm370_vm1, %v369_v59, 255 }
 0x5ff   : > { %v942_v61 = vsel %vm372_vm2, %v371_v60, %v338_v36  ;;  %vm375_vm3 = vcmp.eq.s32.totalorder %v887_v29, %v371_v60  ;;  %vm376_vm4 = vcmp.eq.s32.totalorder %v890_v30, %v371_v60 }
 0x600   : > { %v377_v62 = vsel %vm375_vm3, -inf, %v341_v37  ;;  %v378_v63 = vsel %vm376_vm4, -inf, %v342_v38 }
 0x601   : > { %v379_v0 = vsel %vm234_vm0, %v377_v62, -inf  ;;  %v380_v1 = vsel %vm234_vm0, %v378_v63, -inf }
 0x602   : > { %v381_v2 = vmax.f32 %v379_v0, %v380_v1 }
 0x604   : > { %382 = vmax.xlane.f32.xlu0 %v381_v2 }
 0x677   : > { %v383_v7 = vpop.xlane.xlu0 %382 }
 0x678   : > { %vm384_vm6 = vcmp.eq.f32.partialorder %v377_v62, %v383_v7  ;;  %vm385_vm8 = vcmp.eq.f32.partialorder %v378_v63, %v383_v7  ;;  %v409_v8 = vsel %vm408_vm5, %v383_v7, %v373_v6 }
 0x679   : > { %v386_v31 = vsel %vm384_vm6, %v887_v29, 1073741824  ;;  %v387_v9 = vsel %vm385_vm8, %v890_v30, 1073741824  ;;  %411 = vst [vmem:[%s184_s18] sm:$0x1] %v409_v8 }
 0x67a   : > { %v388_v54 = vsel %vm234_vm0, %v386_v31, 2147483647  ;;  %v389_v10 = vsel %vm234_vm0, %v387_v9, 2147483647 }
 0x67b   : > { %vm390_vm12 = vcmp.lt.s32.totalorder %v388_v54, %v389_v10 }
 0x67c   : > { %v391_v11 = vsel %vm390_vm12, %v388_v54, %v389_v10 }
 0x67d   : > { %v393_v12 = vshra.s32 %v391_v11, 16  ;;  %v392_v14 = vand.u32 65535, %v391_v11 }
 0x67f   : > { %v395_v13 = vcvt.s32.f32 %v393_v12  ;;  %v394_v15 = vcvt.s32.f32 %v392_v14 }
 0x681   : > { %396 = vmin.xlane.f32.xlu1 %v395_v13 }
 0x6f4   : > { %v397_v30 = vpop.xlane.xlu1 %396 }
 0x6f5   : > { %699 = shalt.err (!%p696_p13)
}
 0x6f6   : > { %569 = dma.vmem_to_hbm [thread:$0]  (%p854_p9), %s430_s25, 16, %s432_s26, %s414_s27   ;;  %vm398_vm0 = vcmp.eq.f32.partialorder %v395_v13, %v397_v30  ;;  %v403_v17 = vcvt.f32.s32 %v397_v30 }
 0x6f7   : > { %v399_v16 = vsel %vm398_vm0, %v394_v15, inf  ;;  %s441_s16 = scalar_lea.hbm %s1024_s2, %s778_s12  ;;  %s190_s18 = scalar_lea.vmem [#allocation6], %s877_s7 }
 0x6f8   : > { %400 = vmin.xlane.f32.xlu2 %v399_v16  ;;  %v404_v19 = vshll.u32 %v403_v17, 16  ;;  %s443_s19 = sshll.u32 %s190_s18, 4  ;;  %s445_s20 = sshll.u32 %s441_s16, 4  ;;  %s444_s19 = int_to_ptr.vmem [resolvable:$true] %s443_s19  ;;  %s446_s20 = int_to_ptr.hbm [resolvable:$true] %s445_s20 }
 0x6f9   : > { %s418_s21 = scalar_lea.sflag [#allocation7], %s877_s7  ;;  %s714_s25 = sshra.s32 %s446_s20, 4  ;;  %s715_s25 = int_to_ptr.hbm [resolvable:$true] %s714_s25 }
 0x6fa   : > { %s716_s12 = scalar_lea.hbm %s715_s25, 1  ;;  %s720_s28 = scalar_lea.hbm %s1024_s2, 2 }
 0x6fb   : > { %p717_p0 = scmp.ne.s32.totalorder %s715_s25, %s716_s12  ;;  %p721_p3 = scmp.lt.s32.totalorder %s715_s25, %s1024_s2 }
 0x6fc   : > { %p722_p4 = scmp.lt.s32.totalorder %s720_s28, %s716_s12 }
 0x6fd   : > { %p718_p1 = pnand %p717_p0, %p854_p9 }
 0x6fe   : > { %p723_p5 = por %p722_p4, %p721_p3 }
 0x6ff   : > { %p719_p2 = pneg %p718_p1 }
 0x701   : > { %p724_p6 = pnand %p723_p5, %p719_p2 }
 0x76b   : > { %v401_v18 = vpop.xlane.xlu2 %400 }
 0x76c   : > { %v402_v20 = vcvt.f32.s32 %v401_v18 }
 0x76e   : > { %v405_v21 = vadd.s32 %v404_v19, %v402_v20 }
 0x770   : > { %vm406_vm14 = vcmp.lt.s32.totalorder %v405_v21, 255 }
 0x771   : > { %v407_v22 = vsel %vm406_vm14, %v405_v21, 255 }
 0x772   : > { %v410_v23 = vsel %vm408_vm5, %v407_v22, %v942_v61 }
 0x773   : > { %412 = vst [vmem:[%s190_s18] sm:$0x1] %v410_v23 }
 0x774   : > { %727 = shalt.err (!%p724_p6)
}
 0x775   : > { %570 = dma.vmem_to_hbm [thread:$0]  (%p854_p9), %s444_s19, 16, %s446_s20, %s418_s21  }
 0x776 PF: > { %s457_s7 = sand.u32 1, %s766_s9   ;;  %p578_p7 = pnand %p555_p12, %p861_p11 }
 0x777   : > { %s458_s3 = scalar_lea.sflag [#allocation4], %s457_s7 }
 0x778   : > { %p579_p8 = pneg %p578_p7 }
 0x77a   : > { %757 = dma.done.wait (%p579_p8), %s458_s3, 16  }
 0x77b   : > { %759 = vsyncadd (%p579_p8), %s458_s3, 4294967280  ;;  %s467_s4 = scalar_lea.sflag [#allocation7], %s457_s7 }
 0x77c   : > { %761 = dma.done.wait (%p579_p8), %s467_s4, 16  }
 0x77d   : > { %763 = vsyncadd (%p579_p8), %s467_s4, 4294967280  ;;  %s22_s14 = sadd.s32 1, %s786_s14   ;;  %s1029_s9 = smov %s770_s10 }
 0x77e   : > { %p19_p10 = scmp.ge.s32.totalorder %s22_s14, 4   ;;  %s1030_s10 = smov %s774_s11 }
 0x77f   : > { %s1031_s11 = smov %s859_s23  ;;  %s1032_s12 = smov %s782_s13 }
 0x780   : > { %s1033_s13 = smov %s1035_s17  ;;  %21 = sbr.rel (!%p19_p10) target bundleno = 8 (0x8), region = 89 }
 0x785   :  { %472 = vsyncpa [#allocation3], 1 }
 0x786   :  { %474 = vsyncpa [#allocation3 + $0x1], 1 }
 0x787   :  { %475 = vsyncpa [#allocation4], 1 }
 0x788   :  { %477 = vsyncpa [#allocation4 + $0x1], 1 }
 0x789   :  { %478 = vsyncpa [#allocation7], 1 }
 0x78a   :  { %480 = vsyncpa [#allocation7 + $0x1], 1 }

</bundles_post_ra>
